<compile_context>
chip_gen: v5e
topology: v5e:2x2
jax: 0.10.0
libtpu: 0.0.40
codegen_flags: <defaults>
</compile_context>

<pallas_src>
import functools

import jax
import jax.numpy as jnp
from jax.experimental import pallas as pl
from jax.experimental.pallas import tpu as pltpu


def _bn_kernel(x_ref, lg_ref, beta_ref,
               xhat_ref, mean_ref, var_ref,
               cache_ref, sum_ref, sumsq_ref, scale_ref, shift_ref,
               *, total_count: int, eps: float, use_cache: bool):
    """Two-epoch batch-norm forward.

    Grid: (channel_tiles, 2 epochs, N, lane_tiles); last axis fastest.

    x_ref     : (Ct, TL)       input tile (channels on sublanes, spatial on lanes)
    lg_ref    : (Ct, 1)        log_gamma tile
    beta_ref  : (Ct, 1)        beta tile
    xhat_ref  : (Ct, TL)       normalized output tile
    mean_ref  : (Ct, 1)        per-channel batch mean (written once per channel tile)
    var_ref   : (Ct, 1)        per-channel unbiased batch var + eps
    cache_ref : (N*L, Ct, TL)  epoch-0 -> epoch-1 x cache (dummy when use_cache=False)
    sum/sumsq/scale/shift : (Ct, 1) accumulators & hoisted affine params
    """
    epoch = pl.program_id(1)
    n_id = pl.program_id(2)
    l_id = pl.program_id(3)
    n_lane_tiles = pl.num_programs(3)
    is_first = (n_id == 0) & (l_id == 0)
    cache_idx = n_id * n_lane_tiles + l_id

    # ---------------- epoch 0: accumulate sum / sum-of-squares ----------------
    @pl.when(epoch == 0)
    def _():
        @pl.when(is_first)
        def _():
            sum_ref[...] = jnp.zeros_like(sum_ref)
            sumsq_ref[...] = jnp.zeros_like(sumsq_ref)

        x_raw = x_ref[...]                                      # (Ct, TL)
        if use_cache:
            cache_ref[cache_idx] = x_raw                        # keep for epoch 1
        x = x_raw.astype(jnp.float32)
        # Lane reduction on the VPU/XLU keeps full f32 precision (an MXU
        # x @ ones path may truncate the operand to bf16); kernel is DMA-bound
        # so the XLU slot is free slack.
        sum_ref[...] += jnp.sum(x, axis=1, keepdims=True)
        sumsq_ref[...] += jnp.sum(x * x, axis=1, keepdims=True)

    # -------- epoch 1, first step: finalize stats, hoist scale/shift ---------
    @pl.when((epoch == 1) & is_first)
    def _():
        denom = max(total_count - 1, 1)                         # guard N*H*W == 1
        s = sum_ref[...]
        mean = s * (1.0 / total_count)
        # One-statistical-pass variance (sumsq - sum*mean)/(M-1), f32 accum,
        # clamped against tiny negative cancellation before adding eps.
        # TODO(synk): shifted/Welford accumulation if inputs have |mean| >> std.
        var = jnp.maximum(sumsq_ref[...] - s * mean, 0.0) * (1.0 / denom) + eps
        scale = jnp.exp(lg_ref[...].astype(jnp.float32)) * jax.lax.rsqrt(var)
        scale_ref[...] = scale
        shift_ref[...] = beta_ref[...].astype(jnp.float32) - mean * scale
        mean_ref[...] = mean
        var_ref[...] = var

    # ---------------- epoch 1, every step: normalize the tile ----------------
    @pl.when(epoch == 1)
    def _():
        if use_cache:
            x = cache_ref[cache_idx].astype(jnp.float32)        # VMEM, no HBM read
        else:
            x = x_ref[...].astype(jnp.float32)                  # streamed again
        xhat_ref[...] = (x * scale_ref[...] + shift_ref[...]).astype(xhat_ref.dtype)


def _pick_channel_tile(c: int, bytes_per_channel_slab: int, cache_budget: int):
    """Return (TC, use_cache).

    TC is the sublane (channel) tile: a multiple of 8 dividing C (or all of C).
    Prefers the largest TC whose per-slab x cache (N*HW_pad*TC*itemsize) fits
    the VMEM budget; splits to >=2 slabs only when that costs nothing (keeps
    v7x's two TensorCores fed via the "parallel" channel axis).
    """
    if c % 8 != 0 or c <= 8:
        return c, c * bytes_per_channel_slab <= cache_budget
    divs = [d for d in range(8, c + 1, 8) if c % d == 0]
    fitting = [d for d in divs if d * bytes_per_channel_slab <= cache_budget]
    if fitting:
        tc = max(fitting)
        if tc == c and (c // 2) in fitting:   # free megacore split
            tc = c // 2
        return tc, True
    # Cache doesn't fit even at TC=8: stream x twice, keep slabs moderate.
    small = [d for d in divs if d <= max(8, c // 2)]
    return (max(small) if small else c), False


def _pick_lane_tile(hw_pad: int, tc: int, itemsize: int,
                    target_bytes: int = 4 * 1024 * 1024) -> int:
    """Lane (spatial) tile: multiple of 128 dividing hw_pad, <= ~target/block."""
    best = 128
    tl = 128
    while tl <= hw_pad:
        if hw_pad % tl == 0 and tc * tl * itemsize <= target_bytes:
            best = tl
        tl += 128
    return best


def batchnorm_forward(x, log_gamma, beta, moving_mean, moving_var,
                      *, momentum=0.99, eps=1e-6):
    """Training-mode forward of the flow BatchNorm.

    x: (N, C, H, W)  (NCHW, matching the PyTorch module)
    log_gamma, beta, moving_mean, moving_var: (1, C, 1, 1)

    Returns (x_hat, log_det, new_moving_mean, new_moving_var).
    """
    N, C, H, W = x.shape
    HW = H * W
    M = N * HW
    itemsize = jnp.dtype(x.dtype).itemsize

    # Free reshape only (NCHW is contiguous in (N, C, H*W)); no transposes.
    x3 = x.reshape(N, C, HW)

    # Ragged H*W: zero-pad the lane axis to a multiple of 128 so tiles stay
    # lane-dense (zeros do not perturb sum/sumsq; padded x_hat tail is sliced).
    HW_pad = ((HW + 127) // 128) * 128
    if HW_pad != HW:
        # TODO(synk): a masked remainder tile (pl.BoundedSlice) would avoid this
        # extra HBM pass for ragged spatial sizes.
        x3 = jnp.pad(x3, ((0, 0), (0, 0), (0, HW_pad - HW)))

    lg2 = log_gamma.reshape(C, 1).astype(jnp.float32)
    beta2 = beta.reshape(C, 1).astype(jnp.float32)

    # VMEM budget, conservative across generations (v5e/v6e: 128 MiB physical,
    # v7x: 64 MiB per TensorCore):
    #   cache slab <= 20 MiB, input/output blocks <= 4 MiB each (x2 buffers),
    #   scoped limit 44 MiB < 64 MiB physical on v7x.
    CACHE_BUDGET = 20 * 1024 * 1024
    LANE_TARGET = 4 * 1024 * 1024
    VMEM_LIMIT = 44 * 1024 * 1024

    bytes_per_channel_slab = N * HW_pad * itemsize
    TC, use_cache = _pick_channel_tile(C, bytes_per_channel_slab, CACHE_BUDGET)
    TL = _pick_lane_tile(HW_pad, TC, itemsize, LANE_TARGET)
    CT = C // TC
    L = HW_pad // TL

    kernel = functools.partial(_bn_kernel, total_count=M, eps=float(eps),
                               use_cache=use_cache)

    if use_cache:
        cache_shape = (N * L, TC, TL)
        # Epoch 1 reads x from the VMEM cache; pin x's block index to (0,c,0)
        # during epoch 1 so no streaming DMAs are issued (1 HBM read of x total).
        x_index_map = lambda c, e, n, l: (n * (1 - e), c, l * (1 - e))
    else:
        cache_shape = (1, 8, 128)                    # unused dummy scratch
        x_index_map = lambda c, e, n, l: (n, c, l)   # stream x in both epochs

    grid_spec = pltpu.PrefetchScalarGridSpec(
        num_scalar_prefetch=0,
        grid=(CT, 2, N, L),
        in_specs=[
            pl.BlockSpec((None, TC, TL), x_index_map),
            pl.BlockSpec((TC, 1), lambda c, e, n, l: (c, 0)),
            pl.BlockSpec((TC, 1), lambda c, e, n, l: (c, 0)),
        ],
        out_specs=(
            # During epoch 0 the output block index is pinned to (0, c, 0), so
            # the never-written resident buffer is not flushed until epoch 1's
            # first step overwrites it with valid data (no garbage writeback).
            pl.BlockSpec((None, TC, TL), lambda c, e, n, l: (n * e, c, l * e)),
            pl.BlockSpec((TC, 1), lambda c, e, n, l: (c, 0)),
            pl.BlockSpec((TC, 1), lambda c, e, n, l: (c, 0)),
        ),
        scratch_shapes=[
            pltpu.VMEM(cache_shape, x.dtype),   # epoch-0 -> epoch-1 x cache
            pltpu.VMEM((TC, 1), jnp.float32),   # sum
            pltpu.VMEM((TC, 1), jnp.float32),   # sumsq
            pltpu.VMEM((TC, 1), jnp.float32),   # scale
            pltpu.VMEM((TC, 1), jnp.float32),   # shift
        ],
    )

    reads = 1 if use_cache else 2
    cost = pl.CostEstimate(
        flops=8 * M * C,
        transcendentals=2 * C,
        bytes_accessed=(reads + 1) * N * C * HW_pad * itemsize + 6 * C * 4,
    )

    xhat3, mean2, var2 = pl.pallas_call(
        kernel,
        out_shape=(
            jax.ShapeDtypeStruct((N, C, HW_pad), x.dtype),
            jax.ShapeDtypeStruct((C, 1), jnp.float32),
            jax.ShapeDtypeStruct((C, 1), jnp.float32),
        ),
        grid_spec=grid_spec,
        compiler_params=pltpu.CompilerParams(
            # Channel tiles are independent -> parallel (shards v7x's 2 TCs);
            # epoch / N / lane-tile axes carry the reduction -> arbitrary.
            dimension_semantics=("parallel", "arbitrary", "arbitrary", "arbitrary"),
            vmem_limit_bytes=VMEM_LIMIT,
        ),
        cost_estimate=cost,
    )(x3, lg2, beta2)

    if HW_pad != HW:
        xhat3 = xhat3[:, :, :HW]
    x_hat = xhat3.reshape(N, C, H, W)

    # Tiny per-channel tail math kept in the wrapper (C elements; cheaper than
    # a masked 1-lane store from the kernel).
    log_det = jnp.sum(lg2 - 0.5 * jnp.log(var2))

    mean4 = mean2.reshape(1, C, 1, 1)
    var4 = var2.reshape(1, C, 1, 1)            # already includes eps
    new_moving_mean = moving_mean * momentum + mean4 * (1.0 - momentum)
    new_moving_var = moving_var * momentum + var4 * (1.0 - momentum)

    # TODO(synk): eval-mode branch (normalize with moving stats) and inverse()
    # are plain elementwise reuse of the same scale/shift math; not wired.
    return x_hat, log_det, new_moving_mean, new_moving_var


def _reference_forward(x, log_gamma, beta, eps=1e-6):
    """Pure-JAX reference matching torch.var_mean (unbiased) semantics."""
    axes = (0, 2, 3)
    mean = jnp.mean(x, axis=axes, keepdims=True)
    M = x.shape[0] * x.shape[2] * x.shape[3]
    var = jnp.sum((x - mean) ** 2, axis=axes, keepdims=True) / (M - 1) + eps
    x_hat = (x - mean) / jnp.sqrt(var) * jnp.exp(log_gamma) + beta
    log_det = jnp.sum(log_gamma - 0.5 * jnp.log(var))
    return x_hat, log_det, mean, var


if __name__ == "__main__":
    key = jax.random.PRNGKey(0)
    N, C, H, W = 2, 4, 16, 16

    x = jax.random.normal(key, (N, C, H, W), dtype=jnp.float32) * 2.0 + 0.5

    # Deterministic parameter init (reset_parameters: zeros/zeros; buffers:
    # zeros/ones), param_shape = [1, C, 1, 1].
    param_shape = (1, C, 1, 1)
    log_gamma = jnp.zeros(param_shape, jnp.float32)
    beta = jnp.zeros(param_shape, jnp.float32)
    moving_mean = jnp.zeros(param_shape, jnp.float32)
    moving_var = jnp.ones(param_shape, jnp.float32)

    momentum = 0.99
    eps = 1e-6

    x_hat, log_det, new_mm, new_mv = batchnorm_forward(
        x, log_gamma, beta, moving_mean, moving_var,
        momentum=momentum, eps=eps)
    jax.block_until_ready((x_hat, log_det, new_mm, new_mv))

    # Numerical sanity check against a pure-JAX reference.
    x_hat_ref, log_det_ref, mean_ref, var_ref = _reference_forward(
        x, log_gamma, beta, eps=eps)
    new_mm_ref = moving_mean * momentum + mean_ref * (1.0 - momentum)
    new_mv_ref = moving_var * momentum + var_ref * (1.0 - momentum)

    assert jnp.allclose(x_hat, x_hat_ref, atol=1e-4, rtol=1e-4)
    assert jnp.allclose(log_det, log_det_ref, atol=1e-4, rtol=1e-4)
    assert jnp.allclose(new_mm, new_mm_ref, atol=1e-5, rtol=1e-5)
    assert jnp.allclose(new_mv, new_mv_ref, atol=1e-5, rtol=1e-5)

    print("KERNEL_OK")
</pallas_src>

<mosaic_0001>
module attributes {stable_mosaic.version = 11 : i64} {
  func.func @_bn_kernel(%arg0: i32, %arg1: i32, %arg2: i32, %arg3: i32, %arg4: memref<1x4x256xf32, #tpu.memory_space<vmem>>, %arg5: memref<4x1xf32, #tpu.memory_space<vmem>>, %arg6: memref<4x1xf32, #tpu.memory_space<vmem>>, %arg7: memref<1x4x256xf32, #tpu.memory_space<vmem>>, %arg8: memref<4x1xf32, #tpu.memory_space<vmem>>, %arg9: memref<4x1xf32, #tpu.memory_space<vmem>>, %arg10: memref<2x4x256xf32, #tpu.memory_space<vmem>>, %arg11: memref<4x1xf32, #tpu.memory_space<vmem>>, %arg12: memref<4x1xf32, #tpu.memory_space<vmem>>, %arg13: memref<4x1xf32, #tpu.memory_space<vmem>>, %arg14: memref<4x1xf32, #tpu.memory_space<vmem>>) attributes {dimension_semantics = [#tpu.dimension_semantics<parallel>, #tpu.dimension_semantics<arbitrary>, #tpu.dimension_semantics<arbitrary>, #tpu.dimension_semantics<arbitrary>], iteration_bounds = array<i64: 1, 2, 2, 1>, scalar_prefetch = 0 : i64, scratch_operands = 5 : i64, tpu.core_type = #tpu.core_type<tc>, window_params = [{transform_indices = @transform_0, window_bounds = array<i64: 1, 4, 256>}, {transform_indices = @transform_1, window_bounds = array<i64: 4, 1>}, {transform_indices = @transform_2, window_bounds = array<i64: 4, 1>}, {transform_indices = @transform_3, window_bounds = array<i64: 1, 4, 256>}, {transform_indices = @transform_4, window_bounds = array<i64: 4, 1>}, {transform_indices = @transform_5, window_bounds = array<i64: 4, 1>}]} {
    %c0_i32 = arith.constant 0 : i32
    %0 = arith.cmpi eq, %arg2, %c0_i32 : i32
    %c0_i32_0 = arith.constant 0 : i32
    %1 = arith.cmpi eq, %arg3, %c0_i32_0 : i32
    %2 = arith.andi %0, %1 : i1
    %c1_i32 = arith.constant 1 : i32
    %3 = arith.muli %arg2, %c1_i32 : i32
    %4 = arith.addi %3, %arg3 : i32
    %c0_i32_1 = arith.constant 0 : i32
    %5 = arith.cmpi eq, %arg1, %c0_i32_1 : i32
    %6 = arith.extui %5 : i1 to i32
    %c0_i32_2 = arith.constant 0 : i32
    %7 = arith.cmpi ne, %6, %c0_i32_2 : i32
    scf.if %7 {
      %15 = arith.extui %2 : i1 to i32
      %c0_i32_7 = arith.constant 0 : i32
      %16 = arith.cmpi ne, %15, %c0_i32_7 : i32
      scf.if %16 {
        %cst_21 = arith.constant 0.000000e+00 : f32
        %34 = vector.broadcast %cst_21 : f32 to vector<4x1xf32>
        %c0_22 = arith.constant 0 : index
        %c0_23 = arith.constant 0 : index
        %35 = vector.load %arg11[%c0_22, %c0_23] : memref<4x1xf32, #tpu.memory_space<vmem>>, vector<4x1xf32>
        tpu.vector_store %arg11[%c0_22, %c0_23], %34 {strides = array<i32>} : memref<4x1xf32, #tpu.memory_space<vmem>>, vector<4x1xf32>,
        %cst_24 = arith.constant 0.000000e+00 : f32
        %36 = vector.broadcast %cst_24 : f32 to vector<4x1xf32>
        %c0_25 = arith.constant 0 : index
        %c0_26 = arith.constant 0 : index
        %37 = vector.load %arg12[%c0_25, %c0_26] : memref<4x1xf32, #tpu.memory_space<vmem>>, vector<4x1xf32>
        tpu.vector_store %arg12[%c0_25, %c0_26], %36 {strides = array<i32>} : memref<4x1xf32, #tpu.memory_space<vmem>>, vector<4x1xf32>,
      } else {
      }
      %c0 = arith.constant 0 : index
      %c0_8 = arith.constant 0 : index
      %c0_9 = arith.constant 0 : index
      %17 = vector.load %arg4[%c0, %c0_8, %c0_9] : memref<1x4x256xf32, #tpu.memory_space<vmem>>, vector<1x4x256xf32>
      %18 = vector.shape_cast %17 : vector<1x4x256xf32> to vector<4x256xf32>
      %19 = arith.index_cast %4 : i32 to index
      %c0_10 = arith.constant 0 : index
      %c0_11 = arith.constant 0 : index
      %20 = vector.load %arg10[%19, %c0_10, %c0_11] : memref<2x4x256xf32, #tpu.memory_space<vmem>>, vector<1x4x256xf32>
      %21 = vector.shape_cast %20 : vector<1x4x256xf32> to vector<4x256xf32>
      %22 = vector.shape_cast %18 : vector<4x256xf32> to vector<1x4x256xf32>
      tpu.vector_store %arg10[%19, %c0_10, %c0_11], %22 {strides = array<i32>} : memref<2x4x256xf32, #tpu.memory_space<vmem>>, vector<1x4x256xf32>,
      %c0_12 = arith.constant 0 : index
      %c0_13 = arith.constant 0 : index
      %23 = vector.load %arg11[%c0_12, %c0_13] : memref<4x1xf32, #tpu.memory_space<vmem>>, vector<4x1xf32>
      %cst = arith.constant dense<0.000000e+00> : vector<4xf32>
      %24 = vector.multi_reduction <add>, %18, %cst [1] : vector<4x256xf32> to vector<4xf32>
      %25 = vector.shape_cast %24 : vector<4xf32> to vector<4x1xf32>
      %26 = arith.addf %23, %25 : vector<4x1xf32>
      %c0_14 = arith.constant 0 : index
      %c0_15 = arith.constant 0 : index
      %27 = vector.load %arg11[%c0_14, %c0_15] : memref<4x1xf32, #tpu.memory_space<vmem>>, vector<4x1xf32>
      tpu.vector_store %arg11[%c0_14, %c0_15], %26 {strides = array<i32>} : memref<4x1xf32, #tpu.memory_space<vmem>>, vector<4x1xf32>,
      %c0_16 = arith.constant 0 : index
      %c0_17 = arith.constant 0 : index
      %28 = vector.load %arg12[%c0_16, %c0_17] : memref<4x1xf32, #tpu.memory_space<vmem>>, vector<4x1xf32>
      %29 = arith.mulf %18, %18 : vector<4x256xf32>
      %cst_18 = arith.constant dense<0.000000e+00> : vector<4xf32>
      %30 = vector.multi_reduction <add>, %29, %cst_18 [1] : vector<4x256xf32> to vector<4xf32>
      %31 = vector.shape_cast %30 : vector<4xf32> to vector<4x1xf32>
      %32 = arith.addf %28, %31 : vector<4x1xf32>
      %c0_19 = arith.constant 0 : index
      %c0_20 = arith.constant 0 : index
      %33 = vector.load %arg12[%c0_19, %c0_20] : memref<4x1xf32, #tpu.memory_space<vmem>>, vector<4x1xf32>
      tpu.vector_store %arg12[%c0_19, %c0_20], %32 {strides = array<i32>} : memref<4x1xf32, #tpu.memory_space<vmem>>, vector<4x1xf32>,
    } else {
    }
    %c1_i32_3 = arith.constant 1 : i32
    %8 = arith.cmpi eq, %arg1, %c1_i32_3 : i32
    %9 = arith.andi %8, %2 : i1
    %10 = arith.extui %9 : i1 to i32
    %c0_i32_4 = arith.constant 0 : i32
    %11 = arith.cmpi ne, %10, %c0_i32_4 : i32
    scf.if %11 {
      %c0 = arith.constant 0 : index
      %c0_7 = arith.constant 0 : index
      %15 = vector.load %arg11[%c0, %c0_7] : memref<4x1xf32, #tpu.memory_space<vmem>>, vector<4x1xf32>
      %cst = arith.constant 0.001953125 : f32
      %16 = vector.broadcast %cst : f32 to vector<4x1xf32>
      %17 = arith.mulf %15, %16 : vector<4x1xf32>
      %c0_8 = arith.constant 0 : index
      %c0_9 = arith.constant 0 : index
      %18 = vector.load %arg12[%c0_8, %c0_9] : memref<4x1xf32, #tpu.memory_space<vmem>>, vector<4x1xf32>
      %19 = arith.mulf %15, %17 : vector<4x1xf32>
      %20 = arith.subf %18, %19 : vector<4x1xf32>
      %cst_10 = arith.constant 0.000000e+00 : f32
      %21 = vector.broadcast %cst_10 : f32 to vector<4x1xf32>
      %22 = arith.maximumf %20, %21 : vector<4x1xf32>
      %cst_11 = arith.constant 0.00195694715 : f32
      %23 = vector.broadcast %cst_11 : f32 to vector<4x1xf32>
      %24 = arith.mulf %22, %23 : vector<4x1xf32>
      %cst_12 = arith.constant 9.99999997E-7 : f32
      %25 = vector.broadcast %cst_12 : f32 to vector<4x1xf32>
      %26 = arith.addf %24, %25 : vector<4x1xf32>
      %c0_13 = arith.constant 0 : index
      %c0_14 = arith.constant 0 : index
      %27 = vector.load %arg5[%c0_13, %c0_14] : memref<4x1xf32, #tpu.memory_space<vmem>>, vector<4x1xf32>
      %28 = math.exp %27 : vector<4x1xf32>
      %29 = math.rsqrt %26 : vector<4x1xf32>
      %30 = arith.mulf %28, %29 : vector<4x1xf32>
      %c0_15 = arith.constant 0 : index
      %c0_16 = arith.constant 0 : index
      %31 = vector.load %arg13[%c0_15, %c0_16] : memref<4x1xf32, #tpu.memory_space<vmem>>, vector<4x1xf32>
      tpu.vector_store %arg13[%c0_15, %c0_16], %30 {strides = array<i32>} : memref<4x1xf32, #tpu.memory_space<vmem>>, vector<4x1xf32>,
      %c0_17 = arith.constant 0 : index
      %c0_18 = arith.constant 0 : index
      %32 = vector.load %arg6[%c0_17, %c0_18] : memref<4x1xf32, #tpu.memory_space<vmem>>, vector<4x1xf32>
      %33 = arith.mulf %17, %30 : vector<4x1xf32>
      %34 = arith.subf %32, %33 : vector<4x1xf32>
      %c0_19 = arith.constant 0 : index
      %c0_20 = arith.constant 0 : index
      %35 = vector.load %arg14[%c0_19, %c0_20] : memref<4x1xf32, #tpu.memory_space<vmem>>, vector<4x1xf32>
      tpu.vector_store %arg14[%c0_19, %c0_20], %34 {strides = array<i32>} : memref<4x1xf32, #tpu.memory_space<vmem>>, vector<4x1xf32>,
      %c0_21 = arith.constant 0 : index
      %c0_22 = arith.constant 0 : index
      %36 = vector.load %arg8[%c0_21, %c0_22] : memref<4x1xf32, #tpu.memory_space<vmem>>, vector<4x1xf32>
      tpu.vector_store %arg8[%c0_21, %c0_22], %17 {strides = array<i32>} : memref<4x1xf32, #tpu.memory_space<vmem>>, vector<4x1xf32>,
      %c0_23 = arith.constant 0 : index
      %c0_24 = arith.constant 0 : index
      %37 = vector.load %arg9[%c0_23, %c0_24] : memref<4x1xf32, #tpu.memory_space<vmem>>, vector<4x1xf32>
      tpu.vector_store %arg9[%c0_23, %c0_24], %26 {strides = array<i32>} : memref<4x1xf32, #tpu.memory_space<vmem>>, vector<4x1xf32>,
    } else {
    }
    %c1_i32_5 = arith.constant 1 : i32
    %12 = arith.cmpi eq, %arg1, %c1_i32_5 : i32
    %13 = arith.extui %12 : i1 to i32
    %c0_i32_6 = arith.constant 0 : i32
    %14 = arith.cmpi ne, %13, %c0_i32_6 : i32
    scf.if %14 {
      %15 = arith.index_cast %4 : i32 to index
      %c0 = arith.constant 0 : index
      %c0_7 = arith.constant 0 : index
      %16 = vector.load %arg10[%15, %c0, %c0_7] : memref<2x4x256xf32, #tpu.memory_space<vmem>>, vector<1x4x256xf32>
      %17 = vector.shape_cast %16 : vector<1x4x256xf32> to vector<4x256xf32>
      %c0_8 = arith.constant 0 : index
      %c0_9 = arith.constant 0 : index
      %18 = vector.load %arg13[%c0_8, %c0_9] : memref<4x1xf32, #tpu.memory_space<vmem>>, vector<4x1xf32>
      %19 = vector.broadcast %18 : vector<4x1xf32> to vector<4x256xf32>
      %20 = arith.mulf %17, %19 : vector<4x256xf32>
      %c0_10 = arith.constant 0 : index
      %c0_11 = arith.constant 0 : index
      %21 = vector.load %arg14[%c0_10, %c0_11] : memref<4x1xf32, #tpu.memory_space<vmem>>, vector<4x1xf32>
      %22 = vector.broadcast %21 : vector<4x1xf32> to vector<4x256xf32>
      %23 = arith.addf %20, %22 : vector<4x256xf32>
      %c0_12 = arith.constant 0 : index
      %c0_13 = arith.constant 0 : index
      %c0_14 = arith.constant 0 : index
      %24 = vector.load %arg7[%c0_12, %c0_13, %c0_14] : memref<1x4x256xf32, #tpu.memory_space<vmem>>, vector<1x4x256xf32>
      %25 = vector.shape_cast %24 : vector<1x4x256xf32> to vector<4x256xf32>
      %26 = vector.shape_cast %23 : vector<4x256xf32> to vector<1x4x256xf32>
      tpu.vector_store %arg7[%c0_12, %c0_13, %c0_14], %26 {strides = array<i32>} : memref<1x4x256xf32, #tpu.memory_space<vmem>>, vector<1x4x256xf32>,
    } else {
    }
    return
  }
  func.func @transform_0(%arg0: i32, %arg1: i32, %arg2: i32, %arg3: i32) -> (i32, i32, i32) {
    %c1_i32 = arith.constant 1 : i32
    %0 = arith.subi %c1_i32, %arg1 : i32
    %1 = arith.muli %arg2, %0 : i32
    %c1_i32_0 = arith.constant 1 : i32
    %2 = arith.subi %c1_i32_0, %arg1 : i32
    %3 = arith.muli %arg3, %2 : i32
    %c0_i32 = arith.constant 0 : i32
    return %1, %arg0, %3 : i32, i32, i32
  }
  func.func @transform_1(%arg0: i32, %arg1: i32, %arg2: i32, %arg3: i32) -> (i32, i32) {
    %c0_i32 = arith.constant 0 : i32
    %c0_i32_0 = arith.constant 0 : i32
    return %arg0, %c0_i32 : i32, i32
  }
  func.func @transform_2(%arg0: i32, %arg1: i32, %arg2: i32, %arg3: i32) -> (i32, i32) {
    %c0_i32 = arith.constant 0 : i32
    %c0_i32_0 = arith.constant 0 : i32
    return %arg0, %c0_i32 : i32, i32
  }
  func.func @transform_3(%arg0: i32, %arg1: i32, %arg2: i32, %arg3: i32) -> (i32, i32, i32) {
    %0 = arith.muli %arg2, %arg1 : i32
    %1 = arith.muli %arg3, %arg1 : i32
    %c0_i32 = arith.constant 0 : i32
    return %0, %arg0, %1 : i32, i32, i32
  }
  func.func @transform_4(%arg0: i32, %arg1: i32, %arg2: i32, %arg3: i32) -> (i32, i32) {
    %c0_i32 = arith.constant 0 : i32
    %c0_i32_0 = arith.constant 0 : i32
    return %arg0, %c0_i32 : i32, i32
  }
  func.func @transform_5(%arg0: i32, %arg1: i32, %arg2: i32, %arg3: i32) -> (i32, i32) {
    %c0_i32 = arith.constant 0 : i32
    %c0_i32_0 = arith.constant 0 : i32
    return %arg0, %c0_i32 : i32, i32
  }
}

</mosaic_0001>

<bundles_post_ra>
// kernel: tpu_custom_call.1
= control target key start
LH: loop header
LB: loop body
LE: loop exit
PB: predicated region body
PF: predicated region fallthrough
CT: control target
= control target key end

     0   :  { %s1223_s0 = inlined_call_operand.hbm [shape: f32[2,4,256], index: 0, kind: input, shape index: {}]   ;;  %s1224_s1 = inlined_call_operand.vmem [shape: f32[4,1], index: 1, kind: input, shape index: {}]   ;;  %s1225_s2 = inlined_call_operand.vmem [shape: f32[4,1], index: 2, kind: input, shape index: {}]   ;;  %s1226_s3 = inlined_call_operand.hbm [shape: f32[2,4,256], index: 3, kind: output, shape index: {0}]   ;;  %s1227_s4 = inlined_call_operand.vmem [shape: f32[4,1], index: 4, kind: output, shape index: {1}]   ;;  %s1228_s5 = inlined_call_operand.vmem [shape: f32[4,1], index: 5, kind: output, shape index: {2}]  }
   0x1   :  { %1234 = sst [smem:[#allocation18_spill]] %s1226_s3 }
   0x2   :  { %11 = vsyncpa [#allocation8], 0 }
   0x3   :  { %13 = vsyncpa [#allocation8 + $0x1], 0 }
   0x4   :  { %14 = vsyncpa [#allocation9], 0 }
   0x5   :  { %16 = vsyncpa [#allocation9 + $0x1], 0  ;;  %s1011_s18 = smov 0   ;;  %s1013_s19 = smov 0  }
   0x6   :  { %s1015_s20 = smov 0   ;;  %s1017_s21 = smov 0  }
   0x7   :  { %s1019_s22 = smov 0   ;;  %s1021_s23 = smov 0  }
   0x8   :  { %s1023_s24 = smov 0   ;;  %s1025_s25 = smov 0  }
   0x9   :  { %s1027_s26 = smov 0   ;;  %s1029_s27 = smov 0  }
   0xa   :  { %s1031_s28 = smov 0  }
   0xb LB: > { %1235 = sst [smem:[#allocation13_spill]] %s968_s26  ;;  %s683_s29 = sadd.s32 4294967295, %s976_s28   ;;  %s976_s28 = sphi %s1031_s28, %s22_s28   ;;  %s972_s27 = sphi %s1029_s27, %s1257_s27   ;;  %s968_s26 = sphi %s1027_s26, %s1249_s26   ;;  %s964_s25 = sphi %s1025_s25, %s1248_s25   ;;  %s960_s24 = sphi %s1023_s24, %s1247_s24   ;;  %s956_s23 = sphi %s1021_s23, %s1256_s23   ;;  %s952_s22 = sphi %s1019_s22, %s1255_s22   ;;  %s948_s21 = sphi %s1017_s21, %s1254_s21   ;;  %s944_s20 = sphi %s1015_s20, %s1253_s20   ;;  %s940_s19 = sphi %s1013_s19, %s1252_s19   ;;  %s936_s18 = sphi %s1011_s18, %s1251_s18  }
   0xc   : > { %1236 = sst [smem:[#allocation14_spill]] %s972_s27  ;;  %s40_s6 = sadd.s32 1, %s968_s26 }
   0xd   : > { %s44_s7 = sadd.s32 1, %s972_s27  ;;  %p42_p0 = scmp.ge.s32.totalorder %s40_s6, 2 }
   0xe   : > { %s52_s8 = ssub.s32 1, %s972_s27  ;;  %s65_s10 = sadd.s32 1, %s956_s23 }
   0xf   : > { %s1070_s9 = smul.u32 %s968_s26, %s52_s8  ;;  %s1259_s6 = smov (%p42_p0, %s40_s6), 0 }
  0x10   : > { %1237 = sst [smem:[#allocation15_spill]] %s1259_s6  ;;  %s1261_s7 = smov (!%p42_p0, %s44_s7), %s972_s27 }
  0x11   : > { %p72_p1 = scmp.ne.s32.totalorder %s956_s23, %s952_s22  ;;  %p73_p2 = scmp.eq.s32.totalorder %s976_s28, 0 }
  0x12   : > { %p46_p3 = scmp.ge.s32.totalorder %s1261_s7, 2  ;;  %p78_p4 = scmp.ne.s32.totalorder %s952_s22, %s948_s21 }
  0x13   : > { %p1080_p5 = por %p73_p2, %p72_p1  ;;  %p79_p6 = scmp.eq.s32.totalorder %s683_s29, 0 }
  0x14   : > { %s1263_s7 = smov (%p46_p3, %s1261_s7), 0  ;;  %s140_s13 = smul.u32 %s968_s26, %s972_s27 }
  0x15   : > { %1239 = sst [smem:[#allocation16_spill]] %s1263_s7  ;;  %p1086_p7 = por %p79_p6, %p78_p4 }
  0x16   : > { %s55_s14 = ssub.s32 1, %s1263_s7  ;;  %s142_s15 = smul.u32 %s1263_s7, %s1259_s6 }
  0x17   : > { %s56_s16 = smul.u32 %s55_s14, %s1259_s6  ;;  %s151_s17 = sadd.s32 1, %s944_s20 }
  0x18   : > { %s144_s21 = ssub.s32 %s140_s13, %s142_s15  ;;  %p161_p8 = scmp.ne.s32.totalorder %s944_s20, %s940_s19 }
  0x19   : > { %s58_s8 = ssub.s32 %s1070_s9, %s56_s16  ;;  %p149_p9 = scmp.eq.s32.totalorder %s144_s21, 0 }
  0x1a   : > { %p63_p10 = scmp.eq.s32.totalorder %s58_s8, 0  ;;  %p162_p11 = scmp.eq.s32.totalorder %s683_s29, 3 }
  0x1b   : > { %s1101_s30 = scalar_select %p149_p9, %s944_s20, %s151_s17  }
  0x1c   : > { %s1104_s3 = scalar_select %p63_p10, %s956_s23, %s65_s10  }
  0x1d   : > { %p1106_p12 = por %p162_p11, %p161_p8  ;;  %p167_p13 = scmp.ne.s32.totalorder %s940_s19, %s936_s18 }
  0x1e   : > { %1241 = sst [smem:[#allocation17_spill]] %s1104_s3  ;;  %s1243_s14 = sadd.s32 4294967294, %s976_s28  }
  0x1f   : > { %p168_p0 = scmp.eq.s32.totalorder %s1243_s14, 3  ;;  %p726_p1 = scmp.lt.s32.totalorder %s976_s28, 4 }
  0x20   : > { %s254_s13 = sand.u32 1, %s956_s23   ;;  %s709_s16 = sshll.u32 %s1070_s9, 3 }
  0x21   : > { %p1116_p2 = por %p168_p0, %p167_p13  ;;  %s689_s29 = sshll.u32 %s254_s13, 3 }
  0x22   : > { %s270_s21 = scalar_lea.hbm %s1223_s0, %s709_s16  ;;  %s258_s7 = scalar_lea.vmem [#allocation7], %s689_s29 }
  0x23   : > { %s272_s8 = sshll.u32 %s270_s21, 4  ;;  %s274_s6 = sshll.u32 %s258_s7, 4  ;;  %s273_s8 = int_to_ptr.hbm [resolvable:$true] %s272_s8  ;;  %s275_s6 = int_to_ptr.vmem [resolvable:$true] %s274_s6 }
  0x24   : > { %p719_p3 = pnand %p726_p1, %p1080_p5  ;;  %p692_p4 = scmp.ge.s32.totalorder %s976_s28, 1 }
  0x25   : > { %p279_p6 = scmp.lt.s32.totalorder %s976_s28, 5  ;;  %s255_s14 = scalar_lea.sflag [#allocation8], %s254_s13 }
  0x26   : > { %721 = dma.hbm_to_vmem [thread:$0]  (!%p719_p3), %s273_s8, 128, %s275_s6, %s255_s14  }
  0x27   : > { %p280_p8 = pnand %p692_p4, %p279_p6 }
  0x28   : > { %s285_s9 = sand.u32 (!%p280_p8), 1, %s952_s22  }
  0x29   : > { %283 = sbr.rel (%p280_p8) target bundleno = 404 (0x194), region = 32  ;;  %s693_s26 = sshll.u32 (!%p280_p8), %s285_s9, 3 }
  0x2a   : > { %s286_s3 = scalar_lea.sflag (!%p280_p8), [#allocation8], %s285_s9  ;;  %s289_s17 = scalar_lea.vmem (!%p280_p8), [#allocation7], %s693_s26 }
  0x2e   : > { %927 = dma.done.wait (%p1086_p7), %s286_s3, 128  }
  0x2f   : > { %929 = vsyncadd (%p1086_p7), %s286_s3, 4294967168  ;;  %s318_s7 = sand.u32 1, %s940_s19   ;;  %p356_p5 = scmp.eq.s32.totalorder %s960_s24, 0 }
  0x30   : > { %s1137_s6 = sshll.u32 %s318_s7, 3  ;;  %p696_p9 = scmp.ne.s32.totalorder %s964_s25, 0 }
  0x31   : > { %s320_s11 = scalar_lea.vmem [#allocation10], %s1137_s6 }
  0x32   : > { %364 = sbr.rel (%p696_p9) target bundleno = 199 (0xc7), region = 40 }
  0x37   : > { %366 = sbr.rel (!%p356_p5) target bundleno = 60 (0x3c), region = 44  ;;  %vm367_vm0 = vcmask (%p356_p5), 3072   ;;  %v978_v0 = vmov (%p356_p5), 0.0  }
  0x38   : > { %368 = vst.msk [vmem:[#allocation3] sm:$0xf] (%p356_p5), %vm367_vm0, %v978_v0 }
  0x39   : > { %369 = vst.msk [vmem:[#allocation4] sm:$0xf] (%p356_p5), %vm367_vm0, %v978_v0 }
  0x3c PF: > { %v370_v1 = vld [vmem:[%s289_s17] sm:$0xff]  ;;  %s711_s3 = sshll.u32 %s960_s24, 3  ;;  %vm382_vm1 = vcmask 1043456   ;;  %vm389_vm2 = vcmask 3072  }
  0x3d   : > { %377 = vst [vmem:[#allocation1] ss:$2 sm:$0xff] %v370_v1  ;;  %s373_s26 = scalar_lea.vmem [#allocation2], %s711_s3  ;;  %v392_v2 = vmul.f32 %v370_v1, %v370_v1 }
  0x3e   : > { %374 = vst [vmem:[%s373_s26] sm:$0xff] %v370_v1 }
  0x3f   : > { %v375_v13 = vld [vmem:[#allocation3] sm:$0xf] }
  0x40   : > { %v391_v16 = vld [vmem:[#allocation4] sm:$0xf] }
  0x44   : > { %v378_v3 = vld.sshfl [vmem:[#allocation1] sm:$0xff pattern:$0x75316420]  ;;  %v379_v4 = vld.sshfl [vmem:[#allocation1 + $0x8] sm:$0xff pattern:$0x75316420] }
  0x45   : > { %v383_v5 = vsel %vm382_vm1, %v378_v3, 0.0  ;;  %v384_v6 = vsel %vm382_vm1, %v379_v4, 0.0  ;;  %394 = vst [vmem:[#allocation1] ss:$2 sm:$0xff] %v392_v2 }
  0x46   : > { %v385_v7 = vadd.f32 %v384_v6, %v383_v5 }
  0x48   : > { %386 = vadd.xlane.f32.xlu0 %v385_v7 }
  0x4c   : > { %v395_v8 = vld.sshfl [vmem:[#allocation1] sm:$0xff pattern:$0x75316420]  ;;  %v396_v9 = vld.sshfl [vmem:[#allocation1 + $0x8] sm:$0xff pattern:$0x75316420] }
  0x4d   : > { %v399_v10 = vsel %vm382_vm1, %v395_v8, 0.0  ;;  %v400_v11 = vsel %vm382_vm1, %v396_v9, 0.0 }
  0x4e   : > { %v401_v12 = vadd.f32 %v400_v11, %v399_v10 }
  0x50   : > { %402 = vadd.xlane.f32.xlu0 %v401_v12 }
  0xbb   : > { %v387_v14 = vpop.xlane.xlu0 %386 }
  0xbc   : > { %v388_v15 = vadd.f32 %v387_v14, %v375_v13 }
  0xbe   : > { %390 = vst.msk [vmem:[#allocation3] sm:$0xf] %vm389_vm2, %v388_v15 }
  0xc3   : > { %v403_v17 = vpop.xlane.xlu0 %402 }
  0xc4   : > { %v404_v18 = vadd.f32 %v403_v17, %v391_v16 }
  0xc6   : > { %405 = vst.msk [vmem:[#allocation4] sm:$0xf] %vm389_vm2, %v404_v18 }
  0xc7 PF: > { %p406_p7 = scmp.eq.s32.totalorder %s964_s25, 1 }
  0xc9   : > { %p407_p10 = pnand %p406_p7, %p356_p5 }
  0xcb   : > { %410 = sbr.rel (%p407_p10) target bundleno = 246 (0xf6), region = 48 }
  0xd0   : > { %v411_v19 = vld [vmem:[#allocation3] sm:$0xf]  ;;  %vm433_vm3 = vcmask 3072   ;;  %v413_v21 = vld [vmem:[#allocation4] sm:$0xf] }
  0xd1   : > { %v412_v20 = vmul.f32 0.001953125, %v411_v19  ;;  %v419_v27 = vld [vmem:[%s1224_s1] sm:$0xf] }
  0xd2   : > { %v420_v28 = vmul.f32 1.442695, %v419_v27  ;;  %v435_v38 = vld [vmem:[%s1225_s2] sm:$0xf] }
  0xd3   : > { %v414_v22 = vmul.f32 %v412_v20, %v411_v19  ;;  %439 = vst.msk [vmem:[%s1227_s4] sm:$0xf] %vm433_vm3, %v412_v20 }
  0xd5   : > { %v415_v23 = vsub.f32 %v413_v21, %v414_v22 }
  0xd7   : > { %v416_v24 = vmax.f32 %v415_v23, 0.0 }
  0xd9   : > { %v417_v25 = vmul.f32 0.0019569471, %v416_v24 }
  0xdb   : > { %v418_v26 = vadd.f32 1e-06, %v417_v25 }
  0xdd   : > { %819 = vrsqrt.f32 %v418_v26  ;;  %440 = vst.msk [vmem:[%s1228_s5] sm:$0xf] %vm433_vm3, %v418_v26  ;;  %vm428_vm4 = vweird.f32 %v418_v26 }
  0xde   : > { %821 = vpow2.f32 %v420_v28 }
  0xe3   : > { %v820_v29 = vpop.eup %819 }
  0xe4   : > { %v423_v30 = vmul.f32 %v820_v29, %v418_v26  ;;  %vm429_vm5 = vweird.f32 %v820_v29  ;;  %v822_v34 = vpop.eup %821 }
  0xe5   : > { %vm430_vm6 = vmor %vm428_vm4, %vm429_vm5 }
  0xe6   : > { %v424_v31 = vmul.f32 %v820_v29, %v423_v30 }
  0xe8   : > { %v425_v32 = vmul.f32 0.5, %v424_v31 }
  0xea   : > { %v426_v33 = vsub.f32 1.5, %v425_v32 }
  0xec   : > { %v427_v35 = vmul.f32 %v820_v29, %v426_v33 }
  0xee   : > { %v431_v36 = vsel %vm430_vm6, %v820_v29, %v427_v35 }
  0xef   : > { %v432_v37 = vmul.f32 %v822_v34, %v431_v36 }
  0xf1   : > { %434 = vst.msk [vmem:[#allocation5] sm:$0xf] %vm433_vm3, %v432_v37  ;;  %v436_v39 = vmul.f32 %v432_v37, %v412_v20 }
  0xf3   : > { %v437_v40 = vsub.f32 %v435_v38, %v436_v39 }
  0xf5   : > { %438 = vst.msk [vmem:[#allocation6] sm:$0xf] %vm433_vm3, %v437_v40 }
  0xf6 PF: > { %p699_p11 = scmp.ne.s32.totalorder %s964_s25, 1 }
  0xf7   : > { %s712_s9 = sshll.u32 (!%p699_p11), %s960_s24, 3 }
  0xf8   : > { %443 = sbr.rel (%p699_p11) target bundleno = 383 (0x17f), region = 52  ;;  %s446_s17 = scalar_lea.vmem (!%p699_p11), [#allocation2], %s712_s9 }
  0xfd   : > { %v448_v41 = vld [vmem:[#allocation5] sm:$0xf]  ;;  %v979_v42 = vmov 0   ;;  %v459_v43 = vld [vmem:[#allocation6] sm:$0xf] }
  0xfe   : > { %823 = vset.pattern.permute.xlu0 %v979_v42  ;;  %v980_v44 = vmov 839922192   ;;  %v447_v49 = vld [vmem:[%s446_s17] sm:$0xff] }
  0xff   : > { %451 = vperm.xlu0 %823, %v448_v41   ;;  %v454_v45 = vunpack.c.l.s4 %v980_v44 }
 0x101   : > { %v455_v47 = vunpack.c.0.s8 %v454_v45 }
 0x107   : > { %462 = vperm.xlu0 %823, %v459_v43  }
 0x171   : > { %v452_v46 = vpop.permute.xlu0 %451 }
 0x172   : > { %v456_v48 = vperm.slane %v452_v46, %v455_v47 }
 0x174   : > { %v458_v51 = vmul.f32 %v456_v48, %v447_v49 }
 0x179   : > { %v463_v50 = vpop.permute.xlu0 %462 }
 0x17a   : > { %v467_v52 = vperm.slane %v463_v50, %v455_v47 }
 0x17c   : > { %v469_v53 = vadd.f32 %v467_v52, %v458_v51 }
 0x17e   : > { %470 = vst [vmem:[%s320_s11] sm:$0xff] %v469_v53 }
 0x17f PF: > { %s487_s3 = smul.u32 %s960_s24, %s964_s25  ;;  %s499_s26 = sshll.u32 %s320_s11, 4  ;;  %s500_s26 = int_to_ptr.vmem [resolvable:$true] %s499_s26 }
 0x180   : > { %s1245_s16 = sld [smem:[#allocation18_spill]]  ;;  %s472_s8 = scalar_lea.sflag [#allocation9], %s318_s7 }
 0x181   : > { %s713_s12 = sshll.u32 %s487_s3, 3 }
 0x186   : > { %s497_s10 = scalar_lea.hbm %s1245_s16, %s713_s12  ;;  %s874_s6 = scalar_lea.hbm %s1245_s16, 16 }
 0x187   : > { %s501_s21 = sshll.u32 %s497_s10, 4  ;;  %s502_s21 = int_to_ptr.hbm [resolvable:$true] %s501_s21 }
 0x188   : > { %s868_s14 = sshra.s32 %s502_s21, 4  ;;  %s869_s14 = int_to_ptr.hbm [resolvable:$true] %s868_s14 }
 0x189   : > { %s870_s9 = scalar_lea.hbm %s869_s14, 8  ;;  %p875_p3 = scmp.lt.s32.totalorder %s869_s14, %s1245_s16 }
 0x18a   : > { %p871_p13 = scmp.ne.s32.totalorder %s869_s14, %s870_s9  ;;  %p876_p4 = scmp.lt.s32.totalorder %s874_s6, %s870_s9 }
 0x18c   : > { %p872_p0 = pnand %p871_p13, %p1106_p12  ;;  %p877_p6 = por %p876_p4, %p875_p3 }
 0x18e   : > { %p873_p1 = pneg %p872_p0 }
 0x190   : > { %p878_p8 = pnand %p877_p6, %p873_p1 }
 0x192   : > { %881 = shalt.err (!%p878_p8)
}
 0x193   : > { %716 = dma.vmem_to_hbm [thread:$0]  (%p1106_p12), %s500_s26, 128, %s502_s21, %s472_s8  }
 0x194 PF: > { %p727_p5 = scmp.ge.s32.totalorder %s976_s28, 2  ;;  %s533_s7 = sand.u32 1, %s936_s18  }
 0x195   : > { %s534_s3 = scalar_lea.sflag [#allocation9], %s533_s7 }
 0x196   : > { %p723_p9 = pnand %p727_p5, %p1116_p2 }
 0x198   : > { %p724_p7 = pneg %p723_p9 }
 0x19a   : > { %931 = dma.done.wait (%p724_p7), %s534_s3, 128  }
 0x19b   : > { %933 = vsyncadd (%p724_p7), %s534_s3, 4294967168  ;;  %s22_s28 = sadd.s32 1, %s976_s28   ;;  %s1246_s27 = sld [smem:[#allocation17_spill]] }
 0x19c   : > { %p19_p10 = scmp.ge.s32.totalorder %s22_s28, 6   ;;  %s1247_s24 = sld [smem:[#allocation13_spill]] }
 0x19d   : > { %s1248_s25 = sld [smem:[#allocation14_spill]]  ;;  %s1251_s18 = smov %s940_s19 }
 0x19e   : > { %s1249_s26 = sld [smem:[#allocation15_spill]]  ;;  %s1252_s19 = smov %s944_s20 }
 0x19f   : > { %s1250_s12 = sld [smem:[#allocation16_spill]]  ;;  %s1253_s20 = smov %s1101_s30 }
 0x1a0   : > { %s1254_s21 = smov %s952_s22  ;;  %s1255_s22 = smov %s956_s23 }
 0x1a1   : > { %s1256_s23 = smov %s1246_s27  ;;  %21 = sbr.rel (!%p19_p10) target bundleno = 11 (0xb), region = 125 }
 0x1a5   : > { %s1257_s27 = smov %s1250_s12 }
 0x1a6   :  { %540 = vsyncpa [#allocation8], 1 }
 0x1a7   :  { %542 = vsyncpa [#allocation8 + $0x1], 1 }
 0x1a8   :  { %543 = vsyncpa [#allocation9], 1 }
 0x1a9   :  { %545 = vsyncpa [#allocation9 + $0x1], 1 }

</bundles_post_ra>
